<compile_context>
chip_gen: v6e
topology: v6e:2x2x1
jax: 0.10.0
libtpu: 0.0.40
codegen_flags: <defaults>
</compile_context>

<pallas_src>
import functools

import jax
import jax.numpy as jnp
from jax.experimental import pallas as pl
from jax.experimental.pallas import tpu as pltpu


def _encoder_kernel(x_ref, w1_ref, b1_ref, w2_ref, b2_ref, masks_ref, sel_ref,
                    down_ref, full_ref, p1_ref, p2_ref, *, width):
    # x_ref    : (1, Cin,  H*W)   f32   activation, NC(HW): spatial on lanes
    # w*_ref   : (Cout, 9*C)      bf16  im2col weights (tap-major, channel-minor K)
    # b*_ref   : (Cout, 1)        f32
    # masks_ref: (9, 1, H*W)      f32   0/1 boundary masks per tap (SAME padding)
    # sel_ref  : (H*W, Ho*Wo)     f32   0/1 selector of pool-window top-left pixels
    # down_ref : (1, Cout, Ho*Wo) f32   full_ref : (1, Cout, H*W) f32
    # p*_ref   : (9*C, H*W)       f32   VMEM im2col patches staging scratch
    hw = x_ref.shape[-1]

    def conv3x3_relu(act, patches_ref, w_ref, b_ref):
        # act: (C, H*W) f32. Build the 9 shifted taps with static lane rolls (XLU)
        # + 0/1 boundary masks (reproduces the zero halo of SAME padding), stack
        # them on sublanes in the patches scratch, then do ONE MXU matmul with
        # bf16 operands and fp32 accumulation.
        c = act.shape[0]
        t = 0
        for ky in range(3):
            for kx in range(3):
                dy, dx = ky - 1, kx - 1
                shift = (-(dy * width + dx)) % hw
                tap = act if shift == 0 else pltpu.roll(act, shift, axis=1)
                tap = tap * masks_ref[t]                    # zero the SAME-pad halo
                patches_ref[t * c:(t + 1) * c, :] = tap
                t += 1
        acc = jnp.dot(w_ref[...],                           # (Cout, 9C) bf16
                      patches_ref[...].astype(jnp.bfloat16),  # (9C, H*W) bf16
                      preferred_element_type=jnp.float32)   # (Cout, H*W) f32
        return jnp.maximum(acc + b_ref[...], 0.0)

    # conv1 -> conv2, h1 never leaves VMEM/vregs.
    h1 = conv3x3_relu(x_ref[0].astype(jnp.float32), p1_ref, w1_ref, b1_ref)
    h2 = conv3x3_relu(h1, p2_ref, w2_ref, b2_ref)
    full_ref[0] = h2.astype(full_ref.dtype)                 # lane-dense (Cout, H*W)

    # Fused 2x2 / stride-2 max pool, all lane-dense:
    #   m1[p] = max(h2[p], h2[p+1]);  m2[p] = max(m1[p], m1[p+W])
    # so m2 at p = 2i*W + 2j holds the window max; compact those positions to
    # (Cout, Ho*Wo) with an exact 0/1 selector matmul (no strided gathers).
    m1 = jnp.maximum(h2, pltpu.roll(h2, hw - 1, axis=1))
    m2 = jnp.maximum(m1, pltpu.roll(m1, hw - width, axis=1))
    down_ref[0] = jnp.dot(m2, sel_ref[...],
                          preferred_element_type=jnp.float32).astype(down_ref.dtype)


def _boundary_masks(H, W):
    """(9, 1, H*W) 0/1 masks: mask[t, 0, y*W+x] = 1 iff (y+dy, x+dx) is in-bounds."""
    ys = jnp.arange(H)[:, None]
    xs = jnp.arange(W)[None, :]
    masks = []
    for ky in range(3):
        for kx in range(3):
            dy, dx = ky - 1, kx - 1
            valid = ((ys + dy >= 0) & (ys + dy < H) &
                     (xs + dx >= 0) & (xs + dx < W))
            masks.append(valid.reshape(1, H * W))
    return jnp.stack(masks, axis=0).astype(jnp.float32)


def _pool_selector(H, W):
    """(H*W, Ho*Wo) 0/1 matrix selecting p = 2i*W + 2j into q = i*Wo + j."""
    Ho, Wo = H // 2, W // 2
    p = jnp.arange(H * W)
    y, x = p // W, p % W
    q = jnp.where((y % 2 == 0) & (x % 2 == 0), (y // 2) * Wo + (x // 2), -1)
    return (q[:, None] == jnp.arange(Ho * Wo)[None, :]).astype(jnp.float32)


def encoder_forward(x_nchw, w1_oihw, b1, w2_oihw, b2):
    """Fused Encoder forward.

    x_nchw : (N, Cin, H, W)
    w*_oihw: PyTorch Conv2d weights (Cout, Cin/Cout, 3, 3); b*: (Cout,)
    returns (down, full) in NCHW, matching the PyTorch module's forward().
    """
    N, Cin, H, W = x_nchw.shape
    Cout = w1_oihw.shape[0]
    assert H % 2 == 0 and W % 2 == 0, "fused 2x2 max-pool expects even H, W"
    HW, Ho, Wo = H * W, H // 2, W // 2
    # TODO(synk): for large images add an H-row tile grid axis (row-halo folded
    # into the masks/rolls) so v7x's two TensorCores both get work at N=1 and the
    # per-step VMEM footprint stays bounded; unnecessary at these sizes.

    # NCHW -> NC(HW) is a pure reshape (no transpose).  Weights: OIHW -> bf16
    # im2col (Cout, 9*C) with K index = (ky*3+kx)*C + ci, matching the kernel.
    x_flat = x_nchw.reshape(N, Cin, HW)
    w1f = jnp.transpose(w1_oihw, (0, 2, 3, 1)).reshape(Cout, 9 * Cin).astype(jnp.bfloat16)
    w2f = jnp.transpose(w2_oihw, (0, 2, 3, 1)).reshape(Cout, 9 * Cout).astype(jnp.bfloat16)
    b1r = b1.reshape(Cout, 1).astype(jnp.float32)
    b2r = b2.reshape(Cout, 1).astype(jnp.float32)
    masks = _boundary_masks(H, W)
    sel = _pool_selector(H, W)

    kernel = functools.partial(_encoder_kernel, width=W)
    down, full = pl.pallas_call(
        kernel,
        out_shape=(jax.ShapeDtypeStruct((N, Cout, Ho * Wo), x_nchw.dtype),
                   jax.ShapeDtypeStruct((N, Cout, HW), x_nchw.dtype)),
        grid=(N,),
        in_specs=[
            pl.BlockSpec((1, Cin, HW), lambda n: (n, 0, 0)),
            pl.BlockSpec((Cout, 9 * Cin), lambda n: (0, 0)),
            pl.BlockSpec((Cout, 1), lambda n: (0, 0)),
            pl.BlockSpec((Cout, 9 * Cout), lambda n: (0, 0)),
            pl.BlockSpec((Cout, 1), lambda n: (0, 0)),
            pl.BlockSpec((9, 1, HW), lambda n: (0, 0, 0)),
            pl.BlockSpec((HW, Ho * Wo), lambda n: (0, 0)),
        ],
        out_specs=(
            pl.BlockSpec((1, Cout, Ho * Wo), lambda n: (n, 0, 0)),
            pl.BlockSpec((1, Cout, HW), lambda n: (n, 0, 0)),
        ),
        scratch_shapes=[
            pltpu.VMEM((9 * Cin, HW), jnp.float32),
            pltpu.VMEM((9 * Cout, HW), jnp.float32),
        ],
        compiler_params=pltpu.CompilerParams(
            dimension_semantics=("parallel",),
            vmem_limit_bytes=32 * 1024 * 1024),
    )(x_flat, w1f, b1r, w2f, b2r, masks, sel)

    # Back to the PyTorch NCHW convention: pure reshapes, no transposes.
    return (down.reshape(N, Cout, Ho, Wo), full.reshape(N, Cout, H, W))


if __name__ == "__main__":
    N, Cin, Cout, H, W = 2, 4, 8, 16, 16

    key = jax.random.PRNGKey(0)
    k1, k2, k3, k4, k5 = jax.random.split(key, 5)
    x = jax.random.normal(k1, (N, Cin, H, W), jnp.float32)
    # PyTorch-convention parameters: Conv2d weight (O, I, 3, 3), bias (O,)
    w1 = 0.1 * jax.random.normal(k2, (Cout, Cin, 3, 3), jnp.float32)
    b1 = 0.1 * jax.random.normal(k3, (Cout,), jnp.float32)
    w2 = 0.1 * jax.random.normal(k4, (Cout, Cout, 3, 3), jnp.float32)
    b2 = 0.1 * jax.random.normal(k5, (Cout,), jnp.float32)

    down, full = jax.jit(encoder_forward)(x, w1, b1, w2, b2)
    jax.block_until_ready((down, full))

    # Pure-JAX (XLA, fp32) reference of the PyTorch module.
    def ref_conv(xh, w, b):
        y = jax.lax.conv_general_dilated(
            xh, w, (1, 1), "SAME",
            dimension_numbers=("NCHW", "OIHW", "NCHW"))
        return jax.nn.relu(y + b[None, :, None, None])

    r1 = ref_conv(x, w1, b1)
    r2 = ref_conv(r1, w2, b2)
    rdown = jax.lax.reduce_window(r2, -jnp.inf, jax.lax.max,
                                  (1, 1, 2, 2), (1, 1, 2, 2), "VALID")

    assert down.shape == (N, Cout, H // 2, W // 2)
    assert full.shape == (N, Cout, H, W)
    # Tolerance loosened (per review) because matmul operands are bf16 on the MXU
    # (accumulation, bias, ReLU and pooling stay fp32).
    tol = 5e-2
    assert jnp.allclose(full, r2, atol=tol), float(jnp.max(jnp.abs(full - r2)))
    assert jnp.allclose(down, rdown, atol=tol), float(jnp.max(jnp.abs(down - rdown)))
    print("KERNEL_OK")
</pallas_src>

<mosaic_0001>
module attributes {stable_mosaic.version = 11 : i64} {
  func.func @_encoder_kernel(%arg0: i32, %arg1: memref<1x4x256xf32, #tpu.memory_space<vmem>>, %arg2: memref<8x36xbf16, #tpu.memory_space<vmem>>, %arg3: memref<8x1xf32, #tpu.memory_space<vmem>>, %arg4: memref<8x72xbf16, #tpu.memory_space<vmem>>, %arg5: memref<8x1xf32, #tpu.memory_space<vmem>>, %arg6: memref<9x1x256xf32, #tpu.memory_space<vmem>>, %arg7: memref<256x64xf32, #tpu.memory_space<vmem>>, %arg8: memref<1x8x64xf32, #tpu.memory_space<vmem>>, %arg9: memref<1x8x256xf32, #tpu.memory_space<vmem>>, %arg10: memref<36x256xf32, #tpu.memory_space<vmem>>, %arg11: memref<72x256xf32, #tpu.memory_space<vmem>>) attributes {dimension_semantics = [#tpu.dimension_semantics<parallel>], iteration_bounds = array<i64: 2>, scalar_prefetch = 0 : i64, scratch_operands = 2 : i64, tpu.core_type = #tpu.core_type<tc>, window_params = [{transform_indices = @transform_0, window_bounds = array<i64: 1, 4, 256>}, {pipeline_mode = #tpu.pipeline_mode<synchronous>, transform_indices = @transform_1, window_bounds = array<i64: 8, 36>}, {pipeline_mode = #tpu.pipeline_mode<synchronous>, transform_indices = @transform_2, window_bounds = array<i64: 8, 1>}, {pipeline_mode = #tpu.pipeline_mode<synchronous>, transform_indices = @transform_3, window_bounds = array<i64: 8, 72>}, {pipeline_mode = #tpu.pipeline_mode<synchronous>, transform_indices = @transform_4, window_bounds = array<i64: 8, 1>}, {pipeline_mode = #tpu.pipeline_mode<synchronous>, transform_indices = @transform_5, window_bounds = array<i64: 9, 1, 256>}, {pipeline_mode = #tpu.pipeline_mode<synchronous>, transform_indices = @transform_6, window_bounds = array<i64: 256, 64>}, {transform_indices = @transform_7, window_bounds = array<i64: 1, 8, 64>}, {transform_indices = @transform_8, window_bounds = array<i64: 1, 8, 256>}]} {
    %c0 = arith.constant 0 : index
    %c0_0 = arith.constant 0 : index
    %c0_1 = arith.constant 0 : index
    %0 = vector.load %arg1[%c0, %c0_0, %c0_1] : memref<1x4x256xf32, #tpu.memory_space<vmem>>, vector<1x4x256xf32>
    %1 = vector.shape_cast %0 : vector<1x4x256xf32> to vector<4x256xf32>
    %c17_i32 = arith.constant 17 : i32
    %2 = tpu.dynamic_rotate %1 by %c17_i32 dim 1 : vector<4x256xf32>, i32 -> vector<4x256xf32>
    %c0_2 = arith.constant 0 : index
    %c0_3 = arith.constant 0 : index
    %c0_4 = arith.constant 0 : index
    %3 = vector.load %arg6[%c0_2, %c0_3, %c0_4] : memref<9x1x256xf32, #tpu.memory_space<vmem>>, vector<1x1x256xf32>
    %4 = vector.shape_cast %3 : vector<1x1x256xf32> to vector<1x256xf32>
    %5 = vector.broadcast %4 : vector<1x256xf32> to vector<4x256xf32>
    %6 = arith.mulf %2, %5 : vector<4x256xf32>
    %c0_5 = arith.constant 0 : index
    %c0_6 = arith.constant 0 : index
    %7 = vector.load %arg10[%c0_5, %c0_6] : memref<36x256xf32, #tpu.memory_space<vmem>>, vector<4x256xf32>
    tpu.vector_store %arg10[%c0_5, %c0_6], %6 {strides = array<i32>} : memref<36x256xf32, #tpu.memory_space<vmem>>, vector<4x256xf32>,
    %c16_i32 = arith.constant 16 : i32
    %8 = tpu.dynamic_rotate %1 by %c16_i32 dim 1 : vector<4x256xf32>, i32 -> vector<4x256xf32>
    %c1 = arith.constant 1 : index
    %c0_7 = arith.constant 0 : index
    %c0_8 = arith.constant 0 : index
    %9 = vector.load %arg6[%c1, %c0_7, %c0_8] : memref<9x1x256xf32, #tpu.memory_space<vmem>>, vector<1x1x256xf32>
    %10 = vector.shape_cast %9 : vector<1x1x256xf32> to vector<1x256xf32>
    %11 = vector.broadcast %10 : vector<1x256xf32> to vector<4x256xf32>
    %12 = arith.mulf %8, %11 : vector<4x256xf32>
    %c4 = arith.constant 4 : index
    %c0_9 = arith.constant 0 : index
    %13 = vector.load %arg10[%c4, %c0_9] : memref<36x256xf32, #tpu.memory_space<vmem>>, vector<4x256xf32>
    tpu.vector_store %arg10[%c4, %c0_9], %12 {strides = array<i32>} : memref<36x256xf32, #tpu.memory_space<vmem>>, vector<4x256xf32>,
    %c15_i32 = arith.constant 15 : i32
    %14 = tpu.dynamic_rotate %1 by %c15_i32 dim 1 : vector<4x256xf32>, i32 -> vector<4x256xf32>
    %c2 = arith.constant 2 : index
    %c0_10 = arith.constant 0 : index
    %c0_11 = arith.constant 0 : index
    %15 = vector.load %arg6[%c2, %c0_10, %c0_11] : memref<9x1x256xf32, #tpu.memory_space<vmem>>, vector<1x1x256xf32>
    %16 = vector.shape_cast %15 : vector<1x1x256xf32> to vector<1x256xf32>
    %17 = vector.broadcast %16 : vector<1x256xf32> to vector<4x256xf32>
    %18 = arith.mulf %14, %17 : vector<4x256xf32>
    %c8 = arith.constant 8 : index
    %c0_12 = arith.constant 0 : index
    %19 = vector.load %arg10[%c8, %c0_12] : memref<36x256xf32, #tpu.memory_space<vmem>>, vector<4x256xf32>
    tpu.vector_store %arg10[%c8, %c0_12], %18 {strides = array<i32>} : memref<36x256xf32, #tpu.memory_space<vmem>>, vector<4x256xf32>,
    %c1_i32 = arith.constant 1 : i32
    %20 = tpu.dynamic_rotate %1 by %c1_i32 dim 1 : vector<4x256xf32>, i32 -> vector<4x256xf32>
    %c3 = arith.constant 3 : index
    %c0_13 = arith.constant 0 : index
    %c0_14 = arith.constant 0 : index
    %21 = vector.load %arg6[%c3, %c0_13, %c0_14] : memref<9x1x256xf32, #tpu.memory_space<vmem>>, vector<1x1x256xf32>
    %22 = vector.shape_cast %21 : vector<1x1x256xf32> to vector<1x256xf32>
    %23 = vector.broadcast %22 : vector<1x256xf32> to vector<4x256xf32>
    %24 = arith.mulf %20, %23 : vector<4x256xf32>
    %c12 = arith.constant 12 : index
    %c0_15 = arith.constant 0 : index
    %25 = vector.load %arg10[%c12, %c0_15] : memref<36x256xf32, #tpu.memory_space<vmem>>, vector<4x256xf32>
    tpu.vector_store %arg10[%c12, %c0_15], %24 {strides = array<i32>} : memref<36x256xf32, #tpu.memory_space<vmem>>, vector<4x256xf32>,
    %c4_16 = arith.constant 4 : index
    %c0_17 = arith.constant 0 : index
    %c0_18 = arith.constant 0 : index
    %26 = vector.load %arg6[%c4_16, %c0_17, %c0_18] : memref<9x1x256xf32, #tpu.memory_space<vmem>>, vector<1x1x256xf32>
    %27 = vector.shape_cast %26 : vector<1x1x256xf32> to vector<1x256xf32>
    %28 = vector.broadcast %27 : vector<1x256xf32> to vector<4x256xf32>
    %29 = arith.mulf %1, %28 : vector<4x256xf32>
    %c16 = arith.constant 16 : index
    %c0_19 = arith.constant 0 : index
    %30 = vector.load %arg10[%c16, %c0_19] : memref<36x256xf32, #tpu.memory_space<vmem>>, vector<4x256xf32>
    tpu.vector_store %arg10[%c16, %c0_19], %29 {strides = array<i32>} : memref<36x256xf32, #tpu.memory_space<vmem>>, vector<4x256xf32>,
    %c255_i32 = arith.constant 255 : i32
    %31 = tpu.dynamic_rotate %1 by %c255_i32 dim 1 : vector<4x256xf32>, i32 -> vector<4x256xf32>
    %c5 = arith.constant 5 : index
    %c0_20 = arith.constant 0 : index
    %c0_21 = arith.constant 0 : index
    %32 = vector.load %arg6[%c5, %c0_20, %c0_21] : memref<9x1x256xf32, #tpu.memory_space<vmem>>, vector<1x1x256xf32>
    %33 = vector.shape_cast %32 : vector<1x1x256xf32> to vector<1x256xf32>
    %34 = vector.broadcast %33 : vector<1x256xf32> to vector<4x256xf32>
    %35 = arith.mulf %31, %34 : vector<4x256xf32>
    %c20 = arith.constant 20 : index
    %c0_22 = arith.constant 0 : index
    %36 = vector.load %arg10[%c20, %c0_22] : memref<36x256xf32, #tpu.memory_space<vmem>>, vector<4x256xf32>
    tpu.vector_store %arg10[%c20, %c0_22], %35 {strides = array<i32>} : memref<36x256xf32, #tpu.memory_space<vmem>>, vector<4x256xf32>,
    %c241_i32 = arith.constant 241 : i32
    %37 = tpu.dynamic_rotate %1 by %c241_i32 dim 1 : vector<4x256xf32>, i32 -> vector<4x256xf32>
    %c6 = arith.constant 6 : index
    %c0_23 = arith.constant 0 : index
    %c0_24 = arith.constant 0 : index
    %38 = vector.load %arg6[%c6, %c0_23, %c0_24] : memref<9x1x256xf32, #tpu.memory_space<vmem>>, vector<1x1x256xf32>
    %39 = vector.shape_cast %38 : vector<1x1x256xf32> to vector<1x256xf32>
    %40 = vector.broadcast %39 : vector<1x256xf32> to vector<4x256xf32>
    %41 = arith.mulf %37, %40 : vector<4x256xf32>
    %c24 = arith.constant 24 : index
    %c0_25 = arith.constant 0 : index
    %42 = vector.load %arg10[%c24, %c0_25] : memref<36x256xf32, #tpu.memory_space<vmem>>, vector<4x256xf32>
    tpu.vector_store %arg10[%c24, %c0_25], %41 {strides = array<i32>} : memref<36x256xf32, #tpu.memory_space<vmem>>, vector<4x256xf32>,
    %c240_i32 = arith.constant 240 : i32
    %43 = tpu.dynamic_rotate %1 by %c240_i32 dim 1 : vector<4x256xf32>, i32 -> vector<4x256xf32>
    %c7 = arith.constant 7 : index
    %c0_26 = arith.constant 0 : index
    %c0_27 = arith.constant 0 : index
    %44 = vector.load %arg6[%c7, %c0_26, %c0_27] : memref<9x1x256xf32, #tpu.memory_space<vmem>>, vector<1x1x256xf32>
    %45 = vector.shape_cast %44 : vector<1x1x256xf32> to vector<1x256xf32>
    %46 = vector.broadcast %45 : vector<1x256xf32> to vector<4x256xf32>
    %47 = arith.mulf %43, %46 : vector<4x256xf32>
    %c28 = arith.constant 28 : index
    %c0_28 = arith.constant 0 : index
    %48 = vector.load %arg10[%c28, %c0_28] : memref<36x256xf32, #tpu.memory_space<vmem>>, vector<4x256xf32>
    tpu.vector_store %arg10[%c28, %c0_28], %47 {strides = array<i32>} : memref<36x256xf32, #tpu.memory_space<vmem>>, vector<4x256xf32>,
    %c239_i32 = arith.constant 239 : i32
    %49 = tpu.dynamic_rotate %1 by %c239_i32 dim 1 : vector<4x256xf32>, i32 -> vector<4x256xf32>
    %c8_29 = arith.constant 8 : index
    %c0_30 = arith.constant 0 : index
    %c0_31 = arith.constant 0 : index
    %50 = vector.load %arg6[%c8_29, %c0_30, %c0_31] : memref<9x1x256xf32, #tpu.memory_space<vmem>>, vector<1x1x256xf32>
    %51 = vector.shape_cast %50 : vector<1x1x256xf32> to vector<1x256xf32>
    %52 = vector.broadcast %51 : vector<1x256xf32> to vector<4x256xf32>
    %53 = arith.mulf %49, %52 : vector<4x256xf32>
    %c32 = arith.constant 32 : index
    %c0_32 = arith.constant 0 : index
    %54 = vector.load %arg10[%c32, %c0_32] : memref<36x256xf32, #tpu.memory_space<vmem>>, vector<4x256xf32>
    tpu.vector_store %arg10[%c32, %c0_32], %53 {strides = array<i32>} : memref<36x256xf32, #tpu.memory_space<vmem>>, vector<4x256xf32>,
    %c0_33 = arith.constant 0 : index
    %c0_34 = arith.constant 0 : index
    %55 = vector.load %arg2[%c0_33, %c0_34] : memref<8x36xbf16, #tpu.memory_space<vmem>>, vector<8x36xbf16>
    %c0_35 = arith.constant 0 : index
    %c0_36 = arith.constant 0 : index
    %56 = vector.load %arg10[%c0_35, %c0_36] : memref<36x256xf32, #tpu.memory_space<vmem>>, vector<36x256xf32>
    %57 = arith.truncf %56 : vector<36x256xf32> to vector<36x256xbf16>
    %cst = arith.constant dense<0.000000e+00> : vector<8x256xf32>
    %58 = tpu.matmul %55, %57, %cst {dimension_numbers = #tpu.dot_dimension_numbers<[1], [0], [0], [1], [0, 0, 1, 1], [], []>} : vector<8x36xbf16>, vector<36x256xbf16>, vector<8x256xf32> -> vector<8x256xf32>
    %c0_37 = arith.constant 0 : index
    %c0_38 = arith.constant 0 : index
    %59 = vector.load %arg3[%c0_37, %c0_38] : memref<8x1xf32, #tpu.memory_space<vmem>>, vector<8x1xf32>
    %60 = vector.broadcast %59 : vector<8x1xf32> to vector<8x256xf32>
    %61 = arith.addf %58, %60 : vector<8x256xf32>
    %cst_39 = arith.constant 0.000000e+00 : f32
    %62 = vector.broadcast %cst_39 : f32 to vector<8x256xf32>
    %63 = arith.maximumf %61, %62 : vector<8x256xf32>
    %c17_i32_40 = arith.constant 17 : i32
    %64 = tpu.dynamic_rotate %63 by %c17_i32_40 dim 1 : vector<8x256xf32>, i32 -> vector<8x256xf32>
    %c0_41 = arith.constant 0 : index
    %c0_42 = arith.constant 0 : index
    %c0_43 = arith.constant 0 : index
    %65 = vector.load %arg6[%c0_41, %c0_42, %c0_43] : memref<9x1x256xf32, #tpu.memory_space<vmem>>, vector<1x1x256xf32>
    %66 = vector.shape_cast %65 : vector<1x1x256xf32> to vector<1x256xf32>
    %67 = vector.broadcast %66 : vector<1x256xf32> to vector<8x256xf32>
    %68 = arith.mulf %64, %67 : vector<8x256xf32>
    %c0_44 = arith.constant 0 : index
    %c0_45 = arith.constant 0 : index
    %69 = vector.load %arg11[%c0_44, %c0_45] : memref<72x256xf32, #tpu.memory_space<vmem>>, vector<8x256xf32>
    tpu.vector_store %arg11[%c0_44, %c0_45], %68 {strides = array<i32>} : memref<72x256xf32, #tpu.memory_space<vmem>>, vector<8x256xf32>,
    %c16_i32_46 = arith.constant 16 : i32
    %70 = tpu.dynamic_rotate %63 by %c16_i32_46 dim 1 : vector<8x256xf32>, i32 -> vector<8x256xf32>
    %c1_47 = arith.constant 1 : index
    %c0_48 = arith.constant 0 : index
    %c0_49 = arith.constant 0 : index
    %71 = vector.load %arg6[%c1_47, %c0_48, %c0_49] : memref<9x1x256xf32, #tpu.memory_space<vmem>>, vector<1x1x256xf32>
    %72 = vector.shape_cast %71 : vector<1x1x256xf32> to vector<1x256xf32>
    %73 = vector.broadcast %72 : vector<1x256xf32> to vector<8x256xf32>
    %74 = arith.mulf %70, %73 : vector<8x256xf32>
    %c8_50 = arith.constant 8 : index
    %c0_51 = arith.constant 0 : index
    %75 = vector.load %arg11[%c8_50, %c0_51] : memref<72x256xf32, #tpu.memory_space<vmem>>, vector<8x256xf32>
    tpu.vector_store %arg11[%c8_50, %c0_51], %74 {strides = array<i32>} : memref<72x256xf32, #tpu.memory_space<vmem>>, vector<8x256xf32>,
    %c15_i32_52 = arith.constant 15 : i32
    %76 = tpu.dynamic_rotate %63 by %c15_i32_52 dim 1 : vector<8x256xf32>, i32 -> vector<8x256xf32>
    %c2_53 = arith.constant 2 : index
    %c0_54 = arith.constant 0 : index
    %c0_55 = arith.constant 0 : index
    %77 = vector.load %arg6[%c2_53, %c0_54, %c0_55] : memref<9x1x256xf32, #tpu.memory_space<vmem>>, vector<1x1x256xf32>
    %78 = vector.shape_cast %77 : vector<1x1x256xf32> to vector<1x256xf32>
    %79 = vector.broadcast %78 : vector<1x256xf32> to vector<8x256xf32>
    %80 = arith.mulf %76, %79 : vector<8x256xf32>
    %c16_56 = arith.constant 16 : index
    %c0_57 = arith.constant 0 : index
    %81 = vector.load %arg11[%c16_56, %c0_57] : memref<72x256xf32, #tpu.memory_space<vmem>>, vector<8x256xf32>
    tpu.vector_store %arg11[%c16_56, %c0_57], %80 {strides = array<i32>} : memref<72x256xf32, #tpu.memory_space<vmem>>, vector<8x256xf32>,
    %c1_i32_58 = arith.constant 1 : i32
    %82 = tpu.dynamic_rotate %63 by %c1_i32_58 dim 1 : vector<8x256xf32>, i32 -> vector<8x256xf32>
    %c3_59 = arith.constant 3 : index
    %c0_60 = arith.constant 0 : index
    %c0_61 = arith.constant 0 : index
    %83 = vector.load %arg6[%c3_59, %c0_60, %c0_61] : memref<9x1x256xf32, #tpu.memory_space<vmem>>, vector<1x1x256xf32>
    %84 = vector.shape_cast %83 : vector<1x1x256xf32> to vector<1x256xf32>
    %85 = vector.broadcast %84 : vector<1x256xf32> to vector<8x256xf32>
    %86 = arith.mulf %82, %85 : vector<8x256xf32>
    %c24_62 = arith.constant 24 : index
    %c0_63 = arith.constant 0 : index
    %87 = vector.load %arg11[%c24_62, %c0_63] : memref<72x256xf32, #tpu.memory_space<vmem>>, vector<8x256xf32>
    tpu.vector_store %arg11[%c24_62, %c0_63], %86 {strides = array<i32>} : memref<72x256xf32, #tpu.memory_space<vmem>>, vector<8x256xf32>,
    %c4_64 = arith.constant 4 : index
    %c0_65 = arith.constant 0 : index
    %c0_66 = arith.constant 0 : index
    %88 = vector.load %arg6[%c4_64, %c0_65, %c0_66] : memref<9x1x256xf32, #tpu.memory_space<vmem>>, vector<1x1x256xf32>
    %89 = vector.shape_cast %88 : vector<1x1x256xf32> to vector<1x256xf32>
    %90 = vector.broadcast %89 : vector<1x256xf32> to vector<8x256xf32>
    %91 = arith.mulf %63, %90 : vector<8x256xf32>
    %c32_67 = arith.constant 32 : index
    %c0_68 = arith.constant 0 : index
    %92 = vector.load %arg11[%c32_67, %c0_68] : memref<72x256xf32, #tpu.memory_space<vmem>>, vector<8x256xf32>
    tpu.vector_store %arg11[%c32_67, %c0_68], %91 {strides = array<i32>} : memref<72x256xf32, #tpu.memory_space<vmem>>, vector<8x256xf32>,
    %c255_i32_69 = arith.constant 255 : i32
    %93 = tpu.dynamic_rotate %63 by %c255_i32_69 dim 1 : vector<8x256xf32>, i32 -> vector<8x256xf32>
    %c5_70 = arith.constant 5 : index
    %c0_71 = arith.constant 0 : index
    %c0_72 = arith.constant 0 : index
    %94 = vector.load %arg6[%c5_70, %c0_71, %c0_72] : memref<9x1x256xf32, #tpu.memory_space<vmem>>, vector<1x1x256xf32>
    %95 = vector.shape_cast %94 : vector<1x1x256xf32> to vector<1x256xf32>
    %96 = vector.broadcast %95 : vector<1x256xf32> to vector<8x256xf32>
    %97 = arith.mulf %93, %96 : vector<8x256xf32>
    %c40 = arith.constant 40 : index
    %c0_73 = arith.constant 0 : index
    %98 = vector.load %arg11[%c40, %c0_73] : memref<72x256xf32, #tpu.memory_space<vmem>>, vector<8x256xf32>
    tpu.vector_store %arg11[%c40, %c0_73], %97 {strides = array<i32>} : memref<72x256xf32, #tpu.memory_space<vmem>>, vector<8x256xf32>,
    %c241_i32_74 = arith.constant 241 : i32
    %99 = tpu.dynamic_rotate %63 by %c241_i32_74 dim 1 : vector<8x256xf32>, i32 -> vector<8x256xf32>
    %c6_75 = arith.constant 6 : index
    %c0_76 = arith.constant 0 : index
    %c0_77 = arith.constant 0 : index
    %100 = vector.load %arg6[%c6_75, %c0_76, %c0_77] : memref<9x1x256xf32, #tpu.memory_space<vmem>>, vector<1x1x256xf32>
    %101 = vector.shape_cast %100 : vector<1x1x256xf32> to vector<1x256xf32>
    %102 = vector.broadcast %101 : vector<1x256xf32> to vector<8x256xf32>
    %103 = arith.mulf %99, %102 : vector<8x256xf32>
    %c48 = arith.constant 48 : index
    %c0_78 = arith.constant 0 : index
    %104 = vector.load %arg11[%c48, %c0_78] : memref<72x256xf32, #tpu.memory_space<vmem>>, vector<8x256xf32>
    tpu.vector_store %arg11[%c48, %c0_78], %103 {strides = array<i32>} : memref<72x256xf32, #tpu.memory_space<vmem>>, vector<8x256xf32>,
    %c240_i32_79 = arith.constant 240 : i32
    %105 = tpu.dynamic_rotate %63 by %c240_i32_79 dim 1 : vector<8x256xf32>, i32 -> vector<8x256xf32>
    %c7_80 = arith.constant 7 : index
    %c0_81 = arith.constant 0 : index
    %c0_82 = arith.constant 0 : index
    %106 = vector.load %arg6[%c7_80, %c0_81, %c0_82] : memref<9x1x256xf32, #tpu.memory_space<vmem>>, vector<1x1x256xf32>
    %107 = vector.shape_cast %106 : vector<1x1x256xf32> to vector<1x256xf32>
    %108 = vector.broadcast %107 : vector<1x256xf32> to vector<8x256xf32>
    %109 = arith.mulf %105, %108 : vector<8x256xf32>
    %c56 = arith.constant 56 : index
    %c0_83 = arith.constant 0 : index
    %110 = vector.load %arg11[%c56, %c0_83] : memref<72x256xf32, #tpu.memory_space<vmem>>, vector<8x256xf32>
    tpu.vector_store %arg11[%c56, %c0_83], %109 {strides = array<i32>} : memref<72x256xf32, #tpu.memory_space<vmem>>, vector<8x256xf32>,
    %c239_i32_84 = arith.constant 239 : i32
    %111 = tpu.dynamic_rotate %63 by %c239_i32_84 dim 1 : vector<8x256xf32>, i32 -> vector<8x256xf32>
    %c8_85 = arith.constant 8 : index
    %c0_86 = arith.constant 0 : index
    %c0_87 = arith.constant 0 : index
    %112 = vector.load %arg6[%c8_85, %c0_86, %c0_87] : memref<9x1x256xf32, #tpu.memory_space<vmem>>, vector<1x1x256xf32>
    %113 = vector.shape_cast %112 : vector<1x1x256xf32> to vector<1x256xf32>
    %114 = vector.broadcast %113 : vector<1x256xf32> to vector<8x256xf32>
    %115 = arith.mulf %111, %114 : vector<8x256xf32>
    %c64 = arith.constant 64 : index
    %c0_88 = arith.constant 0 : index
    %116 = vector.load %arg11[%c64, %c0_88] : memref<72x256xf32, #tpu.memory_space<vmem>>, vector<8x256xf32>
    tpu.vector_store %arg11[%c64, %c0_88], %115 {strides = array<i32>} : memref<72x256xf32, #tpu.memory_space<vmem>>, vector<8x256xf32>,
    %c0_89 = arith.constant 0 : index
    %c0_90 = arith.constant 0 : index
    %117 = vector.load %arg4[%c0_89, %c0_90] : memref<8x72xbf16, #tpu.memory_space<vmem>>, vector<8x72xbf16>
    %c0_91 = arith.constant 0 : index
    %c0_92 = arith.constant 0 : index
    %118 = vector.load %arg11[%c0_91, %c0_92] : memref<72x256xf32, #tpu.memory_space<vmem>>, vector<72x256xf32>
    %119 = arith.truncf %118 : vector<72x256xf32> to vector<72x256xbf16>
    %cst_93 = arith.constant dense<0.000000e+00> : vector<8x256xf32>
    %120 = tpu.matmul %117, %119, %cst_93 {dimension_numbers = #tpu.dot_dimension_numbers<[1], [0], [0], [1], [0, 0, 1, 1], [], []>} : vector<8x72xbf16>, vector<72x256xbf16>, vector<8x256xf32> -> vector<8x256xf32>
    %c0_94 = arith.constant 0 : index
    %c0_95 = arith.constant 0 : index
    %121 = vector.load %arg5[%c0_94, %c0_95] : memref<8x1xf32, #tpu.memory_space<vmem>>, vector<8x1xf32>
    %122 = vector.broadcast %121 : vector<8x1xf32> to vector<8x256xf32>
    %123 = arith.addf %120, %122 : vector<8x256xf32>
    %cst_96 = arith.constant 0.000000e+00 : f32
    %124 = vector.broadcast %cst_96 : f32 to vector<8x256xf32>
    %125 = arith.maximumf %123, %124 : vector<8x256xf32>
    %c0_97 = arith.constant 0 : index
    %c0_98 = arith.constant 0 : index
    %c0_99 = arith.constant 0 : index
    %126 = vector.load %arg9[%c0_97, %c0_98, %c0_99] : memref<1x8x256xf32, #tpu.memory_space<vmem>>, vector<1x8x256xf32>
    %127 = vector.shape_cast %126 : vector<1x8x256xf32> to vector<8x256xf32>
    %128 = vector.shape_cast %125 : vector<8x256xf32> to vector<1x8x256xf32>
    tpu.vector_store %arg9[%c0_97, %c0_98, %c0_99], %128 {strides = array<i32>} : memref<1x8x256xf32, #tpu.memory_space<vmem>>, vector<1x8x256xf32>,
    %c255_i32_100 = arith.constant 255 : i32
    %129 = tpu.dynamic_rotate %125 by %c255_i32_100 dim 1 : vector<8x256xf32>, i32 -> vector<8x256xf32>
    %130 = arith.maximumf %125, %129 : vector<8x256xf32>
    %c240_i32_101 = arith.constant 240 : i32
    %131 = tpu.dynamic_rotate %130 by %c240_i32_101 dim 1 : vector<8x256xf32>, i32 -> vector<8x256xf32>
    %132 = arith.maximumf %130, %131 : vector<8x256xf32>
    %c0_102 = arith.constant 0 : index
    %c0_103 = arith.constant 0 : index
    %133 = vector.load %arg7[%c0_102, %c0_103] : memref<256x64xf32, #tpu.memory_space<vmem>>, vector<256x64xf32>
    %cst_104 = arith.constant dense<0.000000e+00> : vector<8x64xf32>
    %134 = tpu.matmul %132, %133, %cst_104 {dimension_numbers = #tpu.dot_dimension_numbers<[1], [0], [0], [1], [0, 0, 1, 1], [], []>} : vector<8x256xf32>, vector<256x64xf32>, vector<8x64xf32> -> vector<8x64xf32>
    %c0_105 = arith.constant 0 : index
    %c0_106 = arith.constant 0 : index
    %c0_107 = arith.constant 0 : index
    %135 = vector.load %arg8[%c0_105, %c0_106, %c0_107] : memref<1x8x64xf32, #tpu.memory_space<vmem>>, vector<1x8x64xf32>
    %136 = vector.shape_cast %135 : vector<1x8x64xf32> to vector<8x64xf32>
    %137 = vector.shape_cast %134 : vector<8x64xf32> to vector<1x8x64xf32>
    tpu.vector_store %arg8[%c0_105, %c0_106, %c0_107], %137 {strides = array<i32>} : memref<1x8x64xf32, #tpu.memory_space<vmem>>, vector<1x8x64xf32>,
    return
  }
  func.func @transform_0(%arg0: i32) -> (i32, i32, i32) {
    %c0_i32 = arith.constant 0 : i32
    %c0_i32_0 = arith.constant 0 : i32
    %c0_i32_1 = arith.constant 0 : i32
    return %arg0, %c0_i32, %c0_i32_0 : i32, i32, i32
  }
  func.func @transform_1(%arg0: i32) -> (i32, i32) {
    %c0_i32 = arith.constant 0 : i32
    %c0_i32_0 = arith.constant 0 : i32
    %c0_i32_1 = arith.constant 0 : i32
    return %c0_i32, %c0_i32_0 : i32, i32
  }
  func.func @transform_2(%arg0: i32) -> (i32, i32) {
    %c0_i32 = arith.constant 0 : i32
    %c0_i32_0 = arith.constant 0 : i32
    %c0_i32_1 = arith.constant 0 : i32
    return %c0_i32, %c0_i32_0 : i32, i32
  }
  func.func @transform_3(%arg0: i32) -> (i32, i32) {
    %c0_i32 = arith.constant 0 : i32
    %c0_i32_0 = arith.constant 0 : i32
    %c0_i32_1 = arith.constant 0 : i32
    return %c0_i32, %c0_i32_0 : i32, i32
  }
  func.func @transform_4(%arg0: i32) -> (i32, i32) {
    %c0_i32 = arith.constant 0 : i32
    %c0_i32_0 = arith.constant 0 : i32
    %c0_i32_1 = arith.constant 0 : i32
    return %c0_i32, %c0_i32_0 : i32, i32
  }
  func.func @transform_5(%arg0: i32) -> (i32, i32, i32) {
    %c0_i32 = arith.constant 0 : i32
    %c0_i32_0 = arith.constant 0 : i32
    %c0_i32_1 = arith.constant 0 : i32
    %c0_i32_2 = arith.constant 0 : i32
    return %c0_i32, %c0_i32_0, %c0_i32_1 : i32, i32, i32
  }
  func.func @transform_6(%arg0: i32) -> (i32, i32) {
    %c0_i32 = arith.constant 0 : i32
    %c0_i32_0 = arith.constant 0 : i32
    %c0_i32_1 = arith.constant 0 : i32
    return %c0_i32, %c0_i32_0 : i32, i32
  }
  func.func @transform_7(%arg0: i32) -> (i32, i32, i32) {
    %c0_i32 = arith.constant 0 : i32
    %c0_i32_0 = arith.constant 0 : i32
    %c0_i32_1 = arith.constant 0 : i32
    return %arg0, %c0_i32, %c0_i32_0 : i32, i32, i32
  }
  func.func @transform_8(%arg0: i32) -> (i32, i32, i32) {
    %c0_i32 = arith.constant 0 : i32
    %c0_i32_0 = arith.constant 0 : i32
    %c0_i32_1 = arith.constant 0 : i32
    return %arg0, %c0_i32, %c0_i32_0 : i32, i32, i32
  }
}

</mosaic_0001>

<bundles_post_ra>
// kernel: encoder_forward.1
= control target key start
LH: loop header
LB: loop body
LE: loop exit
PB: predicated region body
PF: predicated region fallthrough
CT: control target
= control target key end

     0   :  { %s1284_s27 = smov 0   ;;  %s1667_s0 = inlined_call_operand.vmem [shape: f32[2,4,256], index: 0, kind: input, shape index: {}]   ;;  %s1668_s1 = inlined_call_operand.vmem [shape: bf16[8,36], index: 1, kind: input, shape index: {}]   ;;  %s1669_s2 = inlined_call_operand.vmem [shape: f32[8,1], index: 2, kind: input, shape index: {}]   ;;  %s1670_s3 = inlined_call_operand.vmem [shape: bf16[8,72], index: 3, kind: input, shape index: {}]   ;;  %s1671_s4 = inlined_call_operand.vmem [shape: f32[8,1], index: 4, kind: input, shape index: {}]   ;;  %s1672_s5 = inlined_call_operand.vmem [shape: f32[9,1,256], index: 5, kind: input, shape index: {}]   ;;  %s1673_s6 = inlined_call_operand.vmem [shape: f32[256,64], index: 6, kind: input, shape index: {}]   ;;  %s1674_s7 = inlined_call_operand.vmem [shape: f32[2,8,64], index: 7, kind: output, shape index: {0}]   ;;  %s1675_s8 = inlined_call_operand.vmem [shape: f32[2,8,256], index: 8, kind: output, shape index: {1}]  }
   0x1 LB: > { %s1124_s28 = sadd.s32 4294967295, %s1228_s27   ;;  %p1128_p0 = scmp.ge.s32.totalorder %s1228_s27, 1  ;;  %s1228_s27 = sphi %s1284_s27, %s19_s27  }
   0x2   : > { %p265_p1 = scmp.lt.s32.totalorder %s1228_s27, 3 }
   0x4   : > { %p266_p2 = pnand %p1128_p0, %p265_p1 }
   0x5   : > { %p303_p3 = scmp.lt.s32.totalorder (!%p266_p2), %s1124_s28, 1  ;;  %s1230_s13 = smov (!%p266_p2), 127  }
   0x6   : > { %269 = sbr.rel (%p266_p2) target bundleno = 1170 (0x492), region = 48  ;;  %s1231_s14 = smov (!%p266_p2), 111  }
   0x7   : > { %s1232_s15 = smov (!%p266_p2), 112   ;;  %s1233_s16 = smov (!%p266_p2), 113  }
   0x8   : > { %s1234_s17 = smov (!%p266_p2), 16   ;;  %s1235_s18 = smov (!%p266_p2), 1  }
   0x9   : > { %s1236_s19 = smov (!%p266_p2), 17   ;;  %s1237_s20 = smov (!%p266_p2), 15  }
   0xb   : > { %v326_v0 = vlaneseq  ;;  %s1677_s28 = smov (!%p303_p3, %s1124_s28), 1  ;;  %v1137_v4 = vld [vmem:[%s1672_s5 + $0x8] sm:$0x3]  ;;  %v1238_v12 = vmov 0   ;;  %v575_v13 = vld [vmem:[%s1669_s2] sm:$0xff]  ;;  %vm585_vm6 = vcmask 1041408  }
   0xc   : > { %s1156_s29 = sshll.u32 %s1677_s28, 3  ;;  %624 = vmatprep.mubr.bf16.mxu1 %v1238_v12  ;;  %1210 = vset.pattern.permute.xlu0 %v1238_v12  ;;  %v1138_v15 = vld [vmem:[%s1672_s5 + $0xa] sm:$0x3]  ;;  %v1140_v20 = vld [vmem:[%s1672_s5 + $0xe] sm:$0x3]  ;;  %vm581_vm9 = vcmask 293888  }
   0xd   : > { %v334_v1 = vshrl.u32 %v326_v0, 7  ;;  %s307_s10 = scalar_lea.vmem %s1667_s0, %s1156_s29  ;;  %v1330_v14 = vand.u32 127, %v326_v0  ;;  %v1141_v21 = vld [vmem:[%s1672_s5 + $0x10] sm:$0x3]  ;;  %v1139_v28 = vld [vmem:[%s1672_s5 + $0xc] sm:$0x3] }
   0xe   : > { %v318_v5 = vld [vmem:[%s307_s10] sm:$0xff]  ;;  %vm866_vm10 = vcmask 1043456   ;;  %vm862_vm11 = vcmask 588800   ;;  %vm1036_vm12 = vcmask 523264  }
   0xf   : > { %v1295_v2 = vsub.s32 0, %v334_v1  ;;  %v1297_v3 = vsub.s32 1, %v334_v1  ;;  %450 = vrot.lane.b32.xlu1 %v318_v5, %s1230_s13  ;;  %534 = vrot.lane.b32.xlu0 %v318_v5, %s1231_s14  ;;  %v320_v6 = vcombine.high %v318_v5, %v318_v5  ;;  %vm454_vm0 = vcmp.lt.s32.totalorder %v1330_v14, 127  ;;  %v1134_v47 = vld [vmem:[%s1672_s5 + $0x2] sm:$0x3] }
  0x10   : > { %vm508_vm1 = vcmp.lt.s32.totalorder %v1330_v14, 112  ;;  %vm538_vm2 = vcmp.lt.s32.totalorder %v1330_v14, 111  ;;  %vm484_vm3 = vcmp.lt.s32.totalorder %v1330_v14, 113  ;;  %vm351_vm4 = vcmp.lt.s32.totalorder %v1330_v14, 16  ;;  %v1136_v58 = vld [vmem:[%s1672_s5 + $0x6] sm:$0x3] }
  0x11   : > { %v437_v7 = vrot.slane %v1137_v4, %v1295_v2  ;;  %v441_v8 = vrot.slane %v1137_v4, %v1297_v3  ;;  %v463_v18 = vrot.slane %v1138_v15, %v1295_v2  ;;  %v467_v19 = vrot.slane %v1138_v15, %v1297_v3 }
  0x12   : > { %v517_v26 = vrot.slane %v1140_v20, %v1295_v2  ;;  %v521_v27 = vrot.slane %v1140_v20, %v1297_v3  ;;  %v547_v31 = vrot.slane %v1141_v21, %v1295_v2  ;;  %v551_v32 = vrot.slane %v1141_v21, %v1297_v3 }
  0x13   : > { %v442_v9 = vcombine.low %v437_v7, %v441_v8  ;;  %504 = vrot.lane.b32.xlu0 %v318_v5, %s1232_s15  ;;  %452 = vrot.lane.b32.xlu1 %v320_v6, %s1230_s13  ;;  %v493_v37 = vrot.slane %v1139_v28, %v1295_v2  ;;  %v497_v38 = vrot.slane %v1139_v28, %v1297_v3  ;;  %vm405_vm5 = vcmp.lt.s32.totalorder %v1330_v14, 1 }
  0x14   : > { %v360_v56 = vrot.slane %v1134_v47, %v1295_v2  ;;  %v364_v57 = vrot.slane %v1134_v47, %v1297_v3  ;;  %v414_v1 = vrot.slane %v1136_v58, %v1295_v2  ;;  %v418_v4 = vrot.slane %v1136_v58, %v1297_v3 }
  0x15   : > { %v444_v10 = vmul.f32 %v442_v9, %v318_v5  ;;  %vm328_vm7 = vcmp.lt.s32.totalorder %v1330_v14, 17  ;;  %vm381_vm8 = vcmp.lt.s32.totalorder %v1330_v14, 15 }
  0x17   : > { %v446_v11 = vcombine.high %v444_v10, %v444_v10  ;;  %448 = vst [vmem:[#allocation2 + $0x48] sm:$0xf] %v444_v10  ;;  %506 = vrot.lane.b32.xlu1 %v320_v6, %s1232_s15  ;;  %536 = vrot.lane.b32.xlu0 %v320_v6, %s1231_s14 }
  0x19   : > { %449 = vst [vmem:[#allocation2 + $0x28] sm:$0xf] %v446_v11 }
  0x1b   : > { %482 = vrot.lane.b32.xlu1 %v320_v6, %s1233_s16  ;;  %480 = vrot.lane.b32.xlu0 %v318_v5, %s1233_s16 }
  0x1f   : > { %349 = vrot.lane.b32.xlu1 %v320_v6, %s1234_s17  ;;  %347 = vrot.lane.b32.xlu0 %v318_v5, %s1234_s17 }
  0x23   : > { %403 = vrot.lane.b32.xlu1 %v320_v6, %s1235_s18  ;;  %401 = vrot.lane.b32.xlu0 %v318_v5, %s1235_s18 }
  0x27   : > { %324 = vrot.lane.b32.xlu1 %v320_v6, %s1236_s19  ;;  %322 = vrot.lane.b32.xlu0 %v318_v5, %s1236_s19 }
  0x2b   : > { %379 = vrot.lane.b32.xlu1 %v320_v6, %s1237_s20  ;;  %377 = vrot.lane.b32.xlu0 %v318_v5, %s1237_s20  ;;  %v331_v5 = vld [vmem:[%s1672_s5] sm:$0x3] }
  0x2f   : > { %578 = vperm.xlu0 %1210, %v575_v13  }
  0x81   : > { %v451_v16 = vpop.permute.xlu1 %450  ;;  %v535_v17 = vpop.permute.xlu0 %534 }
  0x85   : > { %v505_v22 = vpop.permute.xlu0 %504  ;;  %v453_v23 = vpop.permute.xlu1 %452 }
  0x86   : > { %v455_v24 = vsel %vm454_vm0, %v451_v16, %v453_v23  ;;  %v456_v25 = vsel %vm454_vm0, %v453_v23, %v451_v16 }
  0x87   : > { %v470_v29 = vmul.f32 %v463_v18, %v455_v24  ;;  %v471_v30 = vmul.f32 %v467_v19, %v456_v25  ;;  %v336_v18 = vrot.slane %v331_v5, %v1295_v2  ;;  %v1135_v24 = vld [vmem:[%s1672_s5 + $0x4] sm:$0x3] }
  0x89   : > { %v474_v33 = vrot.slane %v470_v29, 4  ;;  %v475_v34 = vrot.slane %v471_v30, 4  ;;  %v507_v35 = vpop.permute.xlu1 %506  ;;  %v537_v36 = vpop.permute.xlu0 %536 }
  0x8a   : > { %v509_v39 = vsel %vm508_vm1, %v505_v22, %v507_v35  ;;  %v510_v40 = vsel %vm508_vm1, %v507_v35, %v505_v22  ;;  %v539_v41 = vsel %vm538_vm2, %v535_v17, %v537_v36  ;;  %v540_v42 = vsel %vm538_vm2, %v537_v36, %v535_v17 }
  0x8b   : > { %478 = vst [vmem:[#allocation2 + $0x48] sm:$0xf0] %v474_v33  ;;  %479 = vst [vmem:[#allocation2 + $0x28] sm:$0xf0] %v475_v34  ;;  %v524_v43 = vmul.f32 %v517_v26, %v509_v39  ;;  %v525_v44 = vmul.f32 %v521_v27, %v510_v40  ;;  %v554_v45 = vmul.f32 %v547_v31, %v539_v41 }
  0x8c   : > { %v555_v46 = vmul.f32 %v551_v32, %v540_v42  ;;  %v340_v22 = vrot.slane %v331_v5, %v1297_v3  ;;  %v394_v39 = vrot.slane %v1135_v24, %v1297_v3 }
  0x8d   : > { %v528_v48 = vrot.slane %v524_v43, 4  ;;  %v529_v49 = vrot.slane %v525_v44, 4  ;;  %556 = vst [vmem:[#allocation2 + $0x40] sm:$0xf] %v554_v45  ;;  %v483_v50 = vpop.permute.xlu1 %482  ;;  %v481_v51 = vpop.permute.xlu0 %480 }
  0x8e   : > { %557 = vst [vmem:[#allocation2 + $0x38] sm:$0xf] %v555_v46  ;;  %v485_v52 = vsel %vm484_vm3, %v481_v51, %v483_v50  ;;  %v486_v53 = vsel %vm484_vm3, %v483_v50, %v481_v51 }
  0x8f   : > { %532 = vst [vmem:[#allocation2 + $0x8] sm:$0xf0] %v528_v48  ;;  %533 = vst [vmem:[#allocation2 + $0x20] sm:$0xf0] %v529_v49  ;;  %v500_v54 = vmul.f32 %v493_v37, %v485_v52  ;;  %v501_v55 = vmul.f32 %v497_v38, %v486_v53  ;;  %v390_v38 = vrot.slane %v1135_v24, %v1295_v2  ;;  %v558_v52 = vld [vmem:[%s1668_s1] sm:$0xf] }
  0x91   : > { %502 = vst [vmem:[#allocation2 + $0x8] sm:$0xf] %v500_v54  ;;  %503 = vst [vmem:[#allocation2 + $0x20] sm:$0xf] %v501_v55  ;;  %v350_v59 = vpop.permute.xlu1 %349  ;;  %v348_v60 = vpop.permute.xlu0 %347 }
  0x92   : > { %v352_v61 = vsel %vm351_vm4, %v348_v60, %v350_v59  ;;  %v353_v62 = vsel %vm351_vm4, %v350_v59, %v348_v60  ;;  %v564_v23 = vld [vmem:[#allocation2 + $0x28] sm:$0xff] }
  0x93   : > { %v367_v63 = vmul.f32 %v360_v56, %v353_v62  ;;  %v368_v0 = vmul.f32 %v364_v57, %v352_v61  ;;  %v563_v26 = vld [vmem:[#allocation2 + $0x48] sm:$0xff]  ;;  %v1151_v62 = vld [vmem:[%s1672_s5 + $0x10] sm:$0x3] }
  0x94   : > { %v567_v7 = vld [vmem:[#allocation2 + $0x40] sm:$0xf] }
  0x95   : > { %v568_v6 = vld [vmem:[#allocation2 + $0x38] sm:$0xf]  ;;  %v371_v8 = vrot.slane %v367_v63, 4  ;;  %v372_v9 = vrot.slane %v368_v0, 4  ;;  %v404_v10 = vpop.permute.xlu1 %403  ;;  %v402_v11 = vpop.permute.xlu0 %401  ;;  %v573_v15 = vpack.c.bf16 %v567_v7, %v567_v7 }
  0x96   : > { %v574_v13 = vpack.c.bf16 %v568_v6, %v568_v6  ;;  %v406_v16 = vsel %vm405_vm5, %v402_v11, %v404_v10  ;;  %v407_v17 = vsel %vm405_vm5, %v404_v10, %v402_v11  ;;  %v1149_v11 = vld [vmem:[%s1672_s5 + $0xc] sm:$0x3] }
  0x97   : > { %375 = vst [vmem:[#allocation2 + $0x30] sm:$0xf0] %v371_v8  ;;  %376 = vst [vmem:[#allocation2] sm:$0xf0] %v372_v9  ;;  %v421_v19 = vmul.f32 %v414_v1, %v407_v17  ;;  %v422_v20 = vmul.f32 %v418_v4, %v406_v16  ;;  %v587_v21 = vsel %vm585_vm6, %v573_v15, 0  ;;  %v816_v1 = vrot.slane %v1151_v62, %v1295_v2 }
  0x98   : > { %1142 = vmatprep.subr.msk.bf16.mxu1 %vm585_vm6, %v574_v13  ;;  %v566_v25 = vld [vmem:[#allocation2 + $0x20] sm:$0xff]  ;;  %v565_v27 = vld [vmem:[#allocation2 + $0x8] sm:$0xff]  ;;  %v820_v4 = vrot.slane %v1151_v62, %v1297_v3 }
  0x99   : > { %603 = vmatpush1.bf16.msra.mxu1 %v587_v21  ;;  %v425_v28 = vrot.slane %v421_v19, 4  ;;  %v426_v29 = vrot.slane %v422_v20, 4  ;;  %v325_v30 = vpop.permute.xlu1 %324  ;;  %v323_v31 = vpop.permute.xlu0 %322  ;;  %v572_v32 = vpack.c.bf16 %v566_v25, %v564_v23  ;;  %v571_v33 = vpack.c.bf16 %v565_v27, %v563_v26  ;;  %v1150_v13 = vld [vmem:[%s1672_s5 + $0xe] sm:$0x3]  ;;  %v1147_v20 = vld [vmem:[%s1672_s5 + $0x8] sm:$0x3] }
  0x9a   : > { %v329_v34 = vsel %vm328_vm7, %v323_v31, %v325_v30  ;;  %v330_v35 = vsel %vm328_vm7, %v325_v30, %v323_v31  ;;  %v772_v19 = vrot.slane %v1149_v11, %v1295_v2  ;;  %v776_v21 = vrot.slane %v1149_v11, %v1297_v3  ;;  %v1148_v25 = vld [vmem:[%s1672_s5 + $0xa] sm:$0x3] }
  0x9b   : > { %429 = vst [vmem:[#allocation2 + $0x18] sm:$0xf0] %v425_v28  ;;  %430 = vst [vmem:[#allocation2 + $0x10] sm:$0xf0] %v426_v29  ;;  %v343_v36 = vmul.f32 %v336_v18, %v330_v35  ;;  %v344_v37 = vmul.f32 %v340_v22, %v329_v34  ;;  %604 = vmatprep.subr.bf16.mxu1 %v572_v32  ;;  %v794_v23 = vrot.slane %v1150_v13, %v1295_v2 }
  0x9c   : > { %v798_v24 = vrot.slane %v1150_v13, %v1297_v3  ;;  %v728_v29 = vrot.slane %v1147_v20, %v1295_v2  ;;  %v732_v30 = vrot.slane %v1147_v20, %v1297_v3  ;;  %v754_v34 = vrot.slane %v1148_v25, %v1297_v3 }
  0x9d   : > { %605 = vmatpush1.bf16.msra.mxu1 %v571_v33  ;;  %345 = vst [vmem:[#allocation2 + $0x30] sm:$0xf] %v343_v36  ;;  %346 = vst [vmem:[#allocation2] sm:$0xf] %v344_v37  ;;  %v380_v40 = vpop.permute.xlu1 %379  ;;  %v378_v41 = vpop.permute.xlu0 %377  ;;  %v750_v33 = vrot.slane %v1148_v25, %v1295_v2 }
  0x9e   : > { %v382_v42 = vsel %vm381_vm8, %v378_v41, %v380_v40  ;;  %v383_v43 = vsel %vm381_vm8, %v380_v40, %v378_v41 }
  0x9f   : > { %v397_v44 = vmul.f32 %v390_v38, %v383_v43  ;;  %v398_v45 = vmul.f32 %v394_v39, %v382_v42 }
  0xa1   : > { %399 = vst [vmem:[#allocation2 + $0x18] sm:$0xf] %v397_v44  ;;  %400 = vst [vmem:[#allocation2 + $0x10] sm:$0xf] %v398_v45 }
  0xa4   : > { %v560_v46 = vld [vmem:[#allocation2] sm:$0xff]  ;;  %v559_v48 = vld [vmem:[#allocation2 + $0x30] sm:$0xff] }
  0xa8   : > { %v562_v47 = vld [vmem:[#allocation2 + $0x10] sm:$0xff]  ;;  %v561_v49 = vld [vmem:[#allocation2 + $0x18] sm:$0xff] }
  0xa9   : > { %v570_v50 = vpack.c.bf16 %v562_v47, %v560_v46  ;;  %v569_v51 = vpack.c.bf16 %v561_v49, %v559_v48  ;;  %v1145_v49 = vld [vmem:[%s1672_s5 + $0x4] sm:$0x3] }
  0xaa   : > { %v579_v53 = vpop.permute.xlu0 %578 }
  0xab   : > { %606 = vmatprep.subr.bf16.mxu1 %v570_v50  ;;  %v1146_v50 = vld [vmem:[%s1672_s5 + $0x6] sm:$0x3] }
  0xac   : > { %607 = vmatpush1.bf16.msra.mxu1 %v569_v51 }
  0xaf   : > { %1143 = vmatmul.mubr.msk.bf16.vlgmr.msra.gmra.mxu1 %vm581_vm9, %v558_v52 }
  0xb0   : > { %905 = vmatprep.mubr.bf16.mxu1 %v1238_v12  ;;  %v856_v12 = vld [vmem:[%s1671_s4] sm:$0xff] }
 0x16f   : > { %v626_v54 = vpop.f32.mrf.mxu1 }
 0x170   : > { %v627_v55 = vadd.f32 %v626_v54, %v579_v53 }
 0x171   : > { %v628_v56 = vpop.f32.mrf.mxu1 }
 0x172   : > { %v1418_v57 = vmax.f32 %v627_v55, 0.0  ;;  %v629_v58 = vadd.f32 %v628_v56, %v579_v53  ;;  %v690_v55 = vrot.slane %v1145_v49, %v1295_v2  ;;  %v694_v56 = vrot.slane %v1145_v49, %v1297_v3  ;;  %v944_v49 = vld [vmem:[%s1673_s6 + $0x50] sm:$0xff] }
 0x173   : > { %v630_v59 = vpop.f32.mrf.mxu1 }
 0x174   : > { %761 = vrot.lane.b32.xlu0 %v1418_v57, %s1233_s16  ;;  %805 = vrot.lane.b32.xlu1 %v1418_v57, %s1231_s14  ;;  %v1424_v61 = vmax.f32 %v629_v58, 0.0  ;;  %v735_v45 = vmul.f32 %v728_v29, %v1418_v57  ;;  %v716_v58 = vrot.slane %v1146_v50, %v1297_v3 }
 0x175   : > { %v631_v60 = vpop.f32.mrf.mxu1 }
 0x176   : > { %v736_v48 = vmul.f32 %v732_v30, %v1424_v61 }
 0x178   : > { %783 = vrot.lane.b32.xlu0 %v1418_v57, %s1232_s15  ;;  %807 = vrot.lane.b32.xlu1 %v1424_v61, %s1231_s14 }
 0x17c   : > { %739 = vrot.lane.b32.xlu0 %v1418_v57, %s1230_s13  ;;  %763 = vrot.lane.b32.xlu1 %v1424_v61, %s1233_s16 }
 0x180   : > { %679 = vrot.lane.b32.xlu0 %v1418_v57, %s1237_s20  ;;  %785 = vrot.lane.b32.xlu1 %v1424_v61, %s1232_s15 }
 0x184   : > { %701 = vrot.lane.b32.xlu0 %v1418_v57, %s1235_s18  ;;  %741 = vrot.lane.b32.xlu1 %v1424_v61, %s1230_s13 }
 0x188   : > { %635 = vrot.lane.b32.xlu0 %v1418_v57, %s1236_s19  ;;  %681 = vrot.lane.b32.xlu1 %v1424_v61, %s1237_s20 }
 0x18c   : > { %657 = vrot.lane.b32.xlu0 %v1418_v57, %s1234_s17  ;;  %703 = vrot.lane.b32.xlu1 %v1424_v61, %s1235_s18  ;;  %v712_v57 = vrot.slane %v1146_v50, %v1295_v2  ;;  %s1157_s18 = sshll.u32 %s1677_s28, 4  ;;  %v959_v50 = vld [vmem:[%s1673_s6 + $0xc8] sm:$0xff] }
 0x18d   : > { %s316_s21 = scalar_lea.vmem %s1675_s8, %s1157_s18 }
 0x190   : > { %859 = vperm.xlu0 %1210, %v856_v12   ;;  %637 = vrot.lane.b32.xlu1 %v1424_v61, %s1236_s19 }
 0x194   : > { %659 = vrot.lane.b32.xlu1 %v1424_v61, %s1234_s17  ;;  %s311_s17 = scalar_lea.vmem %s1674_s7, %s1156_s29 }
 0x1e6   : > { %v762_v63 = vpop.permute.xlu0 %761  ;;  %v806_v0 = vpop.permute.xlu1 %805 }
 0x1ea   : > { %v784_v5 = vpop.permute.xlu0 %783  ;;  %v808_v6 = vpop.permute.xlu1 %807 }
 0x1eb   : > { %v809_v7 = vsel %vm538_vm2, %v806_v0, %v808_v6  ;;  %v810_v8 = vsel %vm538_vm2, %v808_v6, %v806_v0  ;;  %v641_v6 = vld [vmem:[%s1672_s5] sm:$0x3] }
 0x1ec   : > { %v823_v9 = vmul.f32 %v816_v1, %v809_v7  ;;  %v824_v10 = vmul.f32 %v820_v4, %v810_v8  ;;  %v1144_v7 = vld [vmem:[%s1672_s5 + $0x2] sm:$0x3]  ;;  %v646_v11 = vrot.slane %v641_v6, %v1295_v2  ;;  %v650_v13 = vrot.slane %v641_v6, %v1297_v3 }
 0x1ed   : > { %v934_v6 = vld [vmem:[%s1673_s6] sm:$0xff] }
 0x1ee   : > { %v854_v15 = vpack.c.bf16 %v823_v9, %v823_v9  ;;  %v855_v16 = vpack.c.bf16 %v824_v10, %v824_v10  ;;  %v740_v17 = vpop.permute.xlu0 %739  ;;  %v764_v18 = vpop.permute.xlu1 %763 }
 0x1ef   : > { %v765_v26 = vsel %vm484_vm3, %v762_v63, %v764_v18  ;;  %v766_v27 = vsel %vm484_vm3, %v764_v18, %v762_v63 }
 0x1f0   : > { %1152 = vmatprep.subr.msk.bf16.mxu1 %vm866_vm10, %v855_v16  ;;  %v868_v22 = vsel %vm866_vm10, %v854_v15, 0  ;;  %v779_v35 = vmul.f32 %v772_v19, %v765_v26  ;;  %v780_v36 = vmul.f32 %v776_v21, %v766_v27  ;;  %v668_v15 = vrot.slane %v1144_v7, %v1295_v2  ;;  %v827_v27 = vld [vmem:[%s1670_s3] sm:$0xf] }
 0x1f1   : > { %880 = vmatpush1.bf16.msra.mxu1 %v868_v22  ;;  %v672_v16 = vrot.slane %v1144_v7, %v1297_v3 }
 0x1f2   : > { %v786_v28 = vpop.permute.xlu1 %785  ;;  %v680_v37 = vpop.permute.xlu0 %679 }
 0x1f3   : > { %v787_v31 = vsel %vm508_vm1, %v784_v5, %v786_v28  ;;  %v788_v32 = vsel %vm508_vm1, %v786_v28, %v784_v5 }
 0x1f4   : > { %v801_v38 = vmul.f32 %v794_v23, %v787_v31  ;;  %v802_v39 = vmul.f32 %v798_v24, %v788_v32 }
 0x1f6   : > { %v852_v40 = vpack.c.bf16 %v801_v38, %v779_v35  ;;  %v742_v41 = vpop.permute.xlu1 %741  ;;  %v853_v42 = vpack.c.bf16 %v802_v39, %v780_v36  ;;  %v702_v51 = vpop.permute.xlu0 %701  ;;  %v949_v35 = vld [vmem:[%s1673_s6 + $0x78] sm:$0xff]  ;;  %v964_v36 = vld [vmem:[%s1673_s6 + $0xf0] sm:$0xff] }
 0x1f7   : > { %v743_v43 = vsel %vm454_vm0, %v740_v17, %v742_v41  ;;  %v744_v44 = vsel %vm454_vm0, %v742_v41, %v740_v17  ;;  %v948_v38 = vld [vmem:[%s1673_s6 + $0x70] sm:$0xff] }
 0x1f8   : > { %v757_v46 = vmul.f32 %v750_v33, %v743_v43  ;;  %v758_v47 = vmul.f32 %v754_v34, %v744_v44  ;;  %881 = vmatprep.subr.bf16.mxu1 %v853_v42  ;;  %v965_v34 = vld [vmem:[%s1673_s6 + $0xf8] sm:$0xff]  ;;  %v947_v42 = vld [vmem:[%s1673_s6 + $0x68] sm:$0xff]  ;;  %v962_v44 = vld [vmem:[%s1673_s6 + $0xe0] sm:$0xff] }
 0x1f9   : > { %882 = vmatpush1.bf16.msra.mxu1 %v852_v40  ;;  %1158 = vmatprep.subr.mxu0 %v965_v34  ;;  %v963_v40 = vld [vmem:[%s1673_s6 + $0xe8] sm:$0xff] }
 0x1fa   : > { %v850_v52 = vpack.c.bf16 %v757_v46, %v735_v45  ;;  %v682_v53 = vpop.permute.xlu1 %681  ;;  %v851_v54 = vpack.c.bf16 %v758_v47, %v736_v48  ;;  %v636_v63 = vpop.permute.xlu0 %635  ;;  %1159 = vmatpush3.msra.mxu0 %v949_v35  ;;  %v946_v45 = vld [vmem:[%s1673_s6 + $0x60] sm:$0xff]  ;;  %v961_v46 = vld [vmem:[%s1673_s6 + $0xd8] sm:$0xff]  ;;  %v960_v48 = vld [vmem:[%s1673_s6 + $0xd0] sm:$0xff] }
 0x1fb   : > { %v683_v59 = vsel %vm381_vm8, %v680_v37, %v682_v53  ;;  %v684_v60 = vsel %vm381_vm8, %v682_v53, %v680_v37  ;;  %1160 = vmatprep.subr.mxu0 %v964_v36  ;;  %v945_v47 = vld [vmem:[%s1673_s6 + $0x58] sm:$0xff]  ;;  %v942_v53 = vld [vmem:[%s1673_s6 + $0x40] sm:$0xff] }
 0x1fc   : > { %883 = vmatprep.subr.bf16.mxu1 %v851_v54  ;;  %v697_v0 = vmul.f32 %v690_v55, %v684_v60  ;;  %v698_v1 = vmul.f32 %v694_v56, %v683_v59  ;;  %1161 = vmatpush3.msra.mxu0 %v948_v38  ;;  %v957_v54 = vld [vmem:[%s1673_s6 + $0xb8] sm:$0xff]  ;;  %v956_v56 = vld [vmem:[%s1673_s6 + $0xb0] sm:$0xff]  ;;  %v939_v59 = vld [vmem:[%s1673_s6 + $0x28] sm:$0xff] }
 0x1fd   : > { %884 = vmatpush1.bf16.msra.mxu1 %v850_v52  ;;  %1162 = vmatprep.subr.mxu0 %v963_v40  ;;  %v958_v52 = vld [vmem:[%s1673_s6 + $0xc0] sm:$0xff]  ;;  %v941_v55 = vld [vmem:[%s1673_s6 + $0x38] sm:$0xff] }
 0x1fe   : > { %v704_v61 = vpop.permute.xlu1 %703  ;;  %v658_v19 = vpop.permute.xlu0 %657  ;;  %1163 = vmatpush3.msra.mxu0 %v947_v42  ;;  %v954_v60 = vld [vmem:[%s1673_s6 + $0xa0] sm:$0xff] }
 0x1ff   : > { %v705_v12 = vsel %vm405_vm5, %v702_v51, %v704_v61  ;;  %v706_v62 = vsel %vm405_vm5, %v704_v61, %v702_v51  ;;  %1164 = vmatprep.subr.mxu0 %v962_v44  ;;  %v943_v51 = vld [vmem:[%s1673_s6 + $0x48] sm:$0xff]  ;;  %v938_v61 = vld [vmem:[%s1673_s6 + $0x20] sm:$0xff] }
 0x200   : > { %v719_v4 = vmul.f32 %v712_v57, %v706_v62  ;;  %v720_v5 = vmul.f32 %v716_v58, %v705_v12  ;;  %1165 = vmatpush3.msra.mxu0 %v946_v45  ;;  %v940_v57 = vld [vmem:[%s1673_s6 + $0x30] sm:$0xff]  ;;  %v955_v58 = vld [vmem:[%s1673_s6 + $0xa8] sm:$0xff]  ;;  %v953_v12 = vld [vmem:[%s1673_s6 + $0x98] sm:$0xff] }
 0x201   : > { %1166 = vmatprep.subr.mxu0 %v961_v46  ;;  %v937_v62 = vld [vmem:[%s1673_s6 + $0x18] sm:$0xff] }
 0x202   : > { %v848_v8 = vpack.c.bf16 %v719_v4, %v697_v0  ;;  %v638_v9 = vpop.permute.xlu1 %637  ;;  %v849_v10 = vpack.c.bf16 %v720_v5, %v698_v1  ;;  %1167 = vmatpush3.msra.mxu0 %v945_v47  ;;  %v936_v0 = vld [vmem:[%s1673_s6 + $0x10] sm:$0xff]  ;;  %v951_v1 = vld [vmem:[%s1673_s6 + $0x88] sm:$0xff]  ;;  %v950_v5 = vld [vmem:[%s1673_s6 + $0x80] sm:$0xff] }
 0x203   : > { %v639_v17 = vsel %vm328_vm7, %v636_v63, %v638_v9  ;;  %v640_v18 = vsel %vm328_vm7, %v638_v9, %v636_v63  ;;  %1168 = vmatprep.subr.mxu0 %v960_v48  ;;  %v952_v63 = vld [vmem:[%s1673_s6 + $0x90] sm:$0xff]  ;;  %v935_v4 = vld [vmem:[%s1673_s6 + $0x8] sm:$0xff] }
 0x204   : > { %885 = vmatprep.subr.bf16.mxu1 %v849_v10  ;;  %v653_v23 = vmul.f32 %v646_v11, %v640_v18  ;;  %v654_v2 = vmul.f32 %v650_v13, %v639_v17  ;;  %1169 = vmatpush3.msra.mxu0 %v944_v49 }
 0x205   : > { %886 = vmatpush1.bf16.msra.mxu1 %v848_v8  ;;  %1170 = vmatprep.subr.mxu0 %v959_v50 }
 0x206   : > { %v660_v20 = vpop.permute.xlu1 %659  ;;  %1171 = vmatpush3.msra.mxu0 %v943_v51 }
 0x207   : > { %v661_v21 = vsel %vm351_vm4, %v658_v19, %v660_v20  ;;  %v662_v22 = vsel %vm351_vm4, %v660_v20, %v658_v19  ;;  %1172 = vmatprep.subr.mxu0 %v958_v52 }
 0x208   : > { %v675_v24 = vmul.f32 %v668_v15, %v662_v22  ;;  %v676_v3 = vmul.f32 %v672_v16, %v661_v21  ;;  %1173 = vmatpush3.msra.mxu0 %v942_v53 }
 0x209   : > { %1174 = vmatprep.subr.mxu0 %v957_v54 }
 0x20a   : > { %v846_v25 = vpack.c.bf16 %v675_v24, %v653_v23  ;;  %v847_v26 = vpack.c.bf16 %v676_v3, %v654_v2  ;;  %1175 = vmatpush3.msra.mxu0 %v941_v55 }
 0x20b   : > { %v860_v28 = vpop.permute.xlu0 %859  ;;  %1176 = vmatprep.subr.mxu0 %v956_v56 }
 0x20c   : > { %887 = vmatprep.subr.bf16.mxu1 %v847_v26  ;;  %1177 = vmatpush3.msra.mxu0 %v940_v57 }
 0x20d   : > { %888 = vmatpush1.bf16.msra.mxu1 %v846_v25  ;;  %1178 = vmatprep.subr.mxu0 %v955_v58 }
 0x20e   : > { %1179 = vmatpush3.msra.mxu0 %v939_v59 }
 0x20f   : > { %1180 = vmatprep.subr.mxu0 %v954_v60 }
 0x210   : > { %1153 = vmatmul.mubr.msk.bf16.vlgmr.msra.gmra.mxu1 %vm862_vm11, %v827_v27  ;;  %1181 = vmatpush3.msra.mxu0 %v938_v61 }
 0x211   : > { %1182 = vmatprep.subr.mxu0 %v953_v12 }
 0x212   : > { %1183 = vmatpush3.msra.mxu0 %v937_v62 }
 0x213   : > { %1184 = vmatprep.subr.mxu0 %v952_v63 }
 0x214   : > { %1185 = vmatpush3.msra.mxu0 %v936_v0 }
 0x215   : > { %1186 = vmatprep.subr.mxu0 %v951_v1 }
 0x216   : > { %1187 = vmatpush3.msra.mxu0 %v935_v4 }
 0x217   : > { %1188 = vmatprep.subr.mxu0 %v950_v5 }
 0x218   : > { %1189 = vmatpush3.msra.mxu0 %v934_v6 }
 0x2d0   : > { %v907_v29 = vpop.f32.mrf.mxu1 }
 0x2d1   : > { %v908_v30 = vadd.f32 %v907_v29, %v860_v28 }
 0x2d2   : > { %v909_v31 = vpop.f32.mrf.mxu1 }
 0x2d3   : > { %v1543_v32 = vmax.f32 %v908_v30, 0.0  ;;  %v910_v33 = vadd.f32 %v909_v31, %v860_v28 }
 0x2d4   : > { %v911_v37 = vpop.f32.mrf.mxu1 }
 0x2d5   : > { %916 = vst [vmem:[%s316_s21] sm:$0xff] %v1543_v32  ;;  %v1558_v39 = vmax.f32 %v910_v33, 0.0 }
 0x2d6   : > { %v912_v41 = vpop.f32.mrf.mxu1 }
 0x2d7   : > { %917 = vst [vmem:[%s316_s21 + $0x8] sm:$0xff] %v1558_v39  ;;  %v1211_v43 = vpack.i.bf16 %v1558_v39, %v1543_v32 }
 0x2d9   : > { %1212 = vrot.lane.b32.xlu1 %v1211_v43, %s1230_s13 }
 0x34b   : > { %v1213_v7 = vpop.permute.xlu1 %1212 }
 0x34c   : > { %v1215_v8 = vunpack.i.h.bf16 %v1213_v7  ;;  %v1214_v9 = vunpack.i.l.bf16 %v1213_v7 }
 0x34e   : > { %v922_v10 = vsel %vm454_vm0, %v1214_v9, %v1215_v8  ;;  %v923_v11 = vsel %vm454_vm0, %v1215_v8, %v1214_v9 }
 0x34f   : > { %v924_v13 = vmax.f32 %v1543_v32, %v922_v10  ;;  %v925_v15 = vmax.f32 %v1558_v39, %v923_v11 }
 0x351   : > { %v1216_v16 = vpack.i.bf16 %v925_v15, %v924_v13 }
 0x353   : > { %1217 = vrot.lane.b32.xlu0 %v1216_v16, %s1232_s15 }
 0x3c5   : > { %v1218_v17 = vpop.permute.xlu0 %1217 }
 0x3c6   : > { %v1220_v18 = vunpack.i.h.bf16 %v1218_v17  ;;  %v1219_v19 = vunpack.i.l.bf16 %v1218_v17 }
 0x3c8   : > { %v931_v20 = vsel %vm508_vm1, %v1220_v18, %v1219_v19  ;;  %v930_v21 = vsel %vm508_vm1, %v1219_v19, %v1220_v18 }
 0x3c9   : > { %v933_v22 = vmax.f32 %v925_v15, %v931_v20  ;;  %v932_v23 = vmax.f32 %v924_v13, %v930_v21 }
 0x3cb   : > { %1030 = vmatprep.mubr.f32.mxu0 %v933_v22 }
 0x3cc   : > { %1031 = vmatmul.mubr.f32.vlgmr.msra.gmra.mxu0 %v932_v23 }
 0x48c   : > { %v1190_v2 = vpop.f32.mrf.mxu0 }
 0x48e   : > { %v1191_v24 = vpop.f32.mrf.mxu0 }
 0x48f   : > { %v1192_v3 = vadd.f32 %v1191_v24, %v1190_v2 }
 0x491   : > { %1037 = vst.msk [vmem:[%s311_s17] sm:$0xff] %vm1036_vm12, %v1192_v3 }
 0x492 PF: > { %s19_s27 = sadd.s32 1, %s1228_s27  }
 0x493   : > { %p16_p4 = scmp.ge.s32.totalorder %s19_s27, 4  }
 0x495   :  { %18 = sbr.rel (!%p16_p4) target bundleno = 1 (0x1), region = 98 }

</bundles_post_ra>
